<compile_context>
chip_gen: v6e
topology: v6e:2x2x1
jax: 0.10.0
libtpu: 0.0.40
codegen_flags: <defaults>
</compile_context>

<pallas_src>
import functools
import math

import jax
import jax.numpy as jnp
from jax.experimental import pallas as pl
from jax.experimental.pallas import tpu as pltpu


def _cdiv(a: int, b: int) -> int:
    return -(-a // b)


def _round_up(a: int, b: int) -> int:
    return _cdiv(a, b) * b


def _sublane_pack(dtype) -> int:
    # 8 rows for 32-bit, 16 for 16-bit, 32 for 8-bit dtypes.
    return max(8, 32 // jnp.dtype(dtype).itemsize)


def _vmem_budget_bytes() -> int:
    """Scoped-VMEM budget with headroom; derived from the chip when possible."""
    cap = 64 << 20  # conservative default (v7x per-core physical VMEM)
    try:
        info = pltpu.get_tpu_info()
        cap = int(getattr(info, "vmem_capacity_bytes", cap))
    except Exception:
        pass
    # 75% of physical, never more than 96 MiB (plenty for this kernel).
    return int(min(cap * 3 // 4, 96 << 20))


def _compute_dtype_for(dtype):
    """bf16 compute on chips with a bf16 VPU/EUP (v6e/v7x); f32 elsewhere."""
    if jnp.dtype(dtype) != jnp.dtype(jnp.bfloat16):
        return jnp.dtype(jnp.float32)
    kind = ""
    try:
        kind = jax.devices()[0].device_kind.lower()
    except Exception:
        pass
    if ("v6" in kind) or ("v7" in kind):
        return jnp.dtype(jnp.bfloat16)
    return jnp.dtype(jnp.float32)


def _make_act(act_fn_name: str, compute_dtype):
    if act_fn_name in ("silu", "swish") and compute_dtype == jnp.dtype(jnp.float32):
        def _silu(g):
            # exp and the approximate reciprocal both occupy the EUP slot,
            # keeping the (closest-to-saturating) VALU slot free.
            return g * pl.reciprocal(1.0 + jnp.exp(-g), approx=True)
        return _silu
    return getattr(jax.nn, act_fn_name)


def _glu_split_kernel(gate_ref, up_ref, o_ref, *, act_fn, compute_dtype):
    # gate_ref / up_ref / o_ref: (TR, TH) lane-dense blocks in VMEM.
    gate = gate_ref[...].astype(compute_dtype)
    up = up_ref[...].astype(compute_dtype)
    o_ref[...] = (act_fn(gate) * up).astype(o_ref.dtype)


def _glu_fused_kernel(x_ref, o_ref, *, act_fn, compute_dtype, half):
    # Fallback only (half not a multiple of 128 lanes): in-kernel slice.
    x = x_ref[...]
    gate = x[:, :half].astype(compute_dtype)
    up = x[:, half:].astype(compute_dtype)
    o_ref[...] = (act_fn(gate) * up).astype(o_ref.dtype)


def _pick_tile_h(half: int, itemsize: int, sub: int, max_block_bytes: int):
    """Largest multiple of 128 dividing `half` whose minimal (sub-row) block
    still fits the per-block VMEM cap. None if half % 128 != 0 (fallback)."""
    if half % 128 != 0:
        return None
    base = half // 128
    divs = set()
    d = 1
    while d * d <= base:
        if base % d == 0:
            divs.add(d)
            divs.add(base // d)
        d += 1
    for th in sorted((128 * d for d in divs), reverse=True):
        if sub * th * itemsize <= max_block_bytes:
            return th
    return 128  # always fits


def glu_activation(merged_states: jnp.ndarray,
                   act_fn_name: str = "silu",
                   compute_dtype=None) -> jnp.ndarray:
    """GLU: act(gate) * up, with gate/up = split of the last dim in half."""
    *lead, last = merged_states.shape
    assert last % 2 == 0, "last dim must be even (gate|up)"
    half = last // 2
    rows = math.prod(lead) if lead else 1
    x2d = merged_states.reshape(rows, last)

    dtype = merged_states.dtype
    itemsize = jnp.dtype(dtype).itemsize
    sub = _sublane_pack(dtype)
    rows_pad = _round_up(max(rows, 1), sub)

    if compute_dtype is None:
        compute_dtype = _compute_dtype_for(dtype)
    else:
        compute_dtype = jnp.dtype(compute_dtype)
    act_fn = _make_act(act_fn_name, compute_dtype)

    budget = _vmem_budget_bytes()
    # 2 buffers x 3 operand blocks (gate-in, up-in, out) must fit w/ headroom.
    target_block_bytes = min(8 << 20, budget // 12)
    max_block_bytes = budget // 8

    th = _pick_tile_h(half, itemsize, sub, max_block_bytes)

    if th is not None:
        n_h = half // th
        tr = target_block_bytes // (th * itemsize)
        tr = max(sub, (min(tr, rows_pad) // sub) * sub)
        grid_rows = _cdiv(rows, tr)

        # v7x has 2 TensorCores: make sure small (decode-sized) inputs still
        # produce >= 2 "parallel" grid steps so both cores get work.
        if grid_rows * n_h == 1 and rows > sub:
            tr = _round_up(_cdiv(rows, 2), sub)
            grid_rows = _cdiv(rows, tr)

        kernel = functools.partial(
            _glu_split_kernel, act_fn=act_fn, compute_dtype=compute_dtype)
        out2d = pl.pallas_call(
            kernel,
            out_shape=jax.ShapeDtypeStruct((rows, half), dtype),
            grid_spec=pltpu.PrefetchScalarGridSpec(
                num_scalar_prefetch=0,
                grid=(grid_rows, n_h),
                in_specs=[
                    # gate half: column blocks [0, n_h)
                    pl.BlockSpec((tr, th), lambda i, j: (i, j)),
                    # up half: column blocks [n_h, 2*n_h) of the same array
                    pl.BlockSpec((tr, th), lambda i, j: (i, j + n_h)),
                ],
                out_specs=pl.BlockSpec((tr, th), lambda i, j: (i, j)),
            ),
            compiler_params=pltpu.CompilerParams(
                dimension_semantics=("parallel", "parallel"),
                vmem_limit_bytes=budget),
        )(x2d, x2d)
    else:
        # TODO(synk): half is not a multiple of 128 lanes; the in-kernel slice
        # forces a cross-lane relayout. If this path is ever hot, pad `half`
        # up to a multiple of 128 in the caller instead.
        per_row_bytes = (last + half) * itemsize          # in block + out block
        tr = budget // (2 * per_row_bytes)                # double-buffered
        tr = max(sub, min((tr // sub) * sub, rows_pad, 1024))
        grid_rows = _cdiv(rows, tr)

        kernel = functools.partial(
            _glu_fused_kernel, act_fn=act_fn, compute_dtype=compute_dtype,
            half=half)
        out2d = pl.pallas_call(
            kernel,
            out_shape=jax.ShapeDtypeStruct((rows, half), dtype),
            grid_spec=pltpu.PrefetchScalarGridSpec(
                num_scalar_prefetch=0,
                grid=(grid_rows,),
                in_specs=[pl.BlockSpec((tr, last), lambda i: (i, 0))],
                out_specs=pl.BlockSpec((tr, half), lambda i: (i, 0)),
            ),
            compiler_params=pltpu.CompilerParams(
                dimension_semantics=("parallel",),
                vmem_limit_bytes=budget),
        )(x2d)

    return out2d.reshape(*lead, half)


if __name__ == "__main__":
    key = jax.random.PRNGKey(0)
    # Small shape consistent with the module: (batch=2, seq=8, hidden=256)
    # -> gate/up each 128 wide (lane-aligned halves).
    x = jax.random.normal(key, (2, 8, 256), dtype=jnp.float32)

    out = jax.block_until_ready(glu_activation(x, act_fn_name="silu"))

    # Reference check against plain JAX.
    gate, up = jnp.split(x, 2, axis=-1)
    ref = jax.nn.silu(gate) * up
    assert out.shape == ref.shape == (2, 8, 128)
    # silu uses the EUP approximate reciprocal, so allow a small tolerance.
    max_err = float(jnp.max(jnp.abs(out - ref)))
    assert jnp.allclose(out, ref, atol=2e-2, rtol=2e-2), max_err

    print("KERNEL_OK")
</pallas_src>

<mosaic_0001>
module attributes {stable_mosaic.version = 11 : i64} {
  func.func @_glu_split_kernel(%arg0: i32, %arg1: i32, %arg2: memref<8x128xf32, #tpu.memory_space<vmem>>, %arg3: memref<8x128xf32, #tpu.memory_space<vmem>>, %arg4: memref<8x128xf32, #tpu.memory_space<vmem>>) attributes {dimension_semantics = [#tpu.dimension_semantics<parallel>, #tpu.dimension_semantics<parallel>], iteration_bounds = array<i64: 2, 1>, scalar_prefetch = 0 : i64, scratch_operands = 0 : i64, tpu.core_type = #tpu.core_type<tc>, window_params = [{transform_indices = @transform_0, window_bounds = array<i64: 8, 128>}, {transform_indices = @transform_1, window_bounds = array<i64: 8, 128>}, {transform_indices = @transform_2, window_bounds = array<i64: 8, 128>}]} {
    %c0 = arith.constant 0 : index
    %c0_0 = arith.constant 0 : index
    %0 = vector.load %arg2[%c0, %c0_0] : memref<8x128xf32, #tpu.memory_space<vmem>>, vector<8x128xf32>
    %c0_1 = arith.constant 0 : index
    %c0_2 = arith.constant 0 : index
    %1 = vector.load %arg3[%c0_1, %c0_2] : memref<8x128xf32, #tpu.memory_space<vmem>>, vector<8x128xf32>
    %cst = arith.constant 0.000000e+00 : f32
    %2 = vector.broadcast %cst : f32 to vector<8x128xf32>
    %3 = arith.subf %2, %0 : vector<8x128xf32>
    %4 = math.exp %3 : vector<8x128xf32>
    %cst_3 = arith.constant 1.000000e+00 : f32
    %5 = vector.broadcast %cst_3 : f32 to vector<8x128xf32>
    %6 = arith.addf %5, %4 : vector<8x128xf32>
    %7 = tpu.reciprocal %6 {approx = true} : vector<8x128xf32> -> vector<8x128xf32>
    %8 = arith.mulf %0, %7 : vector<8x128xf32>
    %9 = arith.mulf %8, %1 : vector<8x128xf32>
    %c0_4 = arith.constant 0 : index
    %c0_5 = arith.constant 0 : index
    %10 = vector.load %arg4[%c0_4, %c0_5] : memref<8x128xf32, #tpu.memory_space<vmem>>, vector<8x128xf32>
    tpu.vector_store %arg4[%c0_4, %c0_5], %9 {strides = array<i32>} : memref<8x128xf32, #tpu.memory_space<vmem>>, vector<8x128xf32>,
    return
  }
  func.func @transform_0(%arg0: i32, %arg1: i32) -> (i32, i32) {
    %c0_i32 = arith.constant 0 : i32
    return %arg0, %arg1 : i32, i32
  }
  func.func @transform_1(%arg0: i32, %arg1: i32) -> (i32, i32) {
    %c1_i32 = arith.constant 1 : i32
    %0 = arith.addi %arg1, %c1_i32 : i32
    %c0_i32 = arith.constant 0 : i32
    return %arg0, %0 : i32, i32
  }
  func.func @transform_2(%arg0: i32, %arg1: i32) -> (i32, i32) {
    %c0_i32 = arith.constant 0 : i32
    return %arg0, %arg1 : i32, i32
  }
}

</mosaic_0001>

<bundles_post_ra>
// kernel: tpu_custom_call.1
= control target key start
LH: loop header
LB: loop body
LE: loop exit
PB: predicated region body
PF: predicated region fallthrough
CT: control target
= control target key end

     0   :  { %7 = vsyncpa [#allocation3], 0  ;;  %s767_s0 = inlined_call_operand.hbm [shape: f32[16,256], index: 0, kind: input, shape index: {}]   ;;  %s768_s1 = inlined_call_operand.hbm [shape: f32[16,256], index: 1, kind: input, shape index: {}]   ;;  %s769_s2 = inlined_call_operand.hbm [shape: f32[16,128], index: 2, kind: output, shape index: {}]  }
   0x1   :  { %9 = vsyncpa [#allocation3 + $0x1], 0 }
   0x2   :  { %10 = vsyncpa [#allocation6], 0 }
   0x3   :  { %12 = vsyncpa [#allocation6 + $0x1], 0 }
   0x4   :  { %13 = vsyncpa [#allocation4], 0 }
   0x5   :  { %15 = vsyncpa [#allocation4 + $0x1], 0  ;;  %s606_s9 = smov 0   ;;  %s608_s10 = smov 0  }
   0x6   :  { %s610_s11 = smov 0   ;;  %s612_s12 = smov 0  }
   0x7   :  { %s614_s13 = smov 0   ;;  %s616_s14 = smov 0  }
   0x8 LB: > { %s354_s15 = sadd.s32 4294967295, %s586_s14   ;;  %s355_s16 = sadd.s32 4294967294, %s586_s14   ;;  %s586_s14 = sphi %s616_s14, %s21_s14   ;;  %s582_s13 = sphi %s614_s13, %s781_s13   ;;  %s578_s12 = sphi %s612_s12, %s780_s12   ;;  %s574_s11 = sphi %s610_s11, %s779_s11   ;;  %s570_s10 = sphi %s608_s10, %s778_s10   ;;  %s566_s9 = sphi %s606_s9, %s777_s9  }
   0x9   : > { %s33_s17 = sadd.s32 1, %s582_s13  ;;  %s42_s18 = sadd.s32 1, %s574_s11 }
   0xa   : > { %p35_p0 = scmp.ge.s32.totalorder %s33_s17, 2  ;;  %p49_p1 = scmp.ne.s32.totalorder %s574_s11, %s570_s10 }
   0xb   : > { %p50_p2 = scmp.eq.s32.totalorder %s586_s14, 0  ;;  %p55_p3 = scmp.ne.s32.totalorder %s570_s10, %s566_s9 }
   0xc   : > { %s783_s17 = smov (%p35_p0, %s33_s17), 0  ;;  %p56_p5 = scmp.eq.s32.totalorder %s354_s15, 0 }
   0xd   : > { %p647_p4 = por %p50_p2, %p49_p1  ;;  %s37_s20 = ssub.s32 %s582_s13, %s783_s17 }
   0xe   : > { %p111_p6 = scmp.eq.s32.totalorder %s354_s15, 1  ;;  %p40_p7 = scmp.eq.s32.totalorder %s37_s20, 0 }
   0xf   : > { %p653_p8 = por %p56_p5, %p55_p3  ;;  %p117_p10 = scmp.eq.s32.totalorder %s355_s16, 1 }
  0x10   : > { %p657_p9 = por %p111_p6, %p49_p1  ;;  %p391_p13 = scmp.lt.s32.totalorder %s586_s14, 2 }
  0x11   : > { %s662_s23 = scalar_select %p40_p7, %s574_s11, %s42_s18  }
  0x12   : > { %p664_p11 = por %p117_p10, %p55_p3  ;;  %s671_s25 = sand.u32 1, %s574_s11  }
  0x13   : > { %s358_s26 = sshll.u32 %s671_s25, 3  ;;  %s372_s27 = sshll.u32 %s582_s13, 8 }
  0x14   : > { %s148_s30 = scalar_lea.hbm %s767_s0, %s372_s27  ;;  %s141_s3 = scalar_lea.vmem [#allocation2], %s358_s26 }
  0x15   : > { %s150_s4 = sshll.u32 %s141_s3, 4  ;;  %p680_p0 = pnand %p391_p13, %p647_p4  ;;  %s151_s4 = int_to_ptr.vmem [resolvable:$true] %s150_s4 }
  0x16   : > { %p364_p1 = scmp.ge.s32.totalorder %s586_s14, 1  ;;  %p176_p2 = scmp.lt.s32.totalorder %s586_s14, 3 }
  0x17   : > { %s138_s6 = scalar_lea.sflag [#allocation3], %s671_s25  ;;  %p447_p3 = pneg %p680_p0 }
  0x18   : > { %s458_s7 = scalar_lea.vmem %s151_s4, 128  ;;  %s588_s8 = smov [#allocation2]  }
  0x19   : > { %p459_p5 = scmp.ne.s32.totalorder %s151_s4, %s458_s7  ;;  %s463_s15 = sshll.u32 %s588_s8, 4  ;;  %s464_s15 = int_to_ptr.vmem [resolvable:$false] %s463_s15 }
  0x1a   : > { %s465_s16 = scalar_lea.vmem %s464_s15, 256  ;;  %p466_p4 = scmp.lt.s32.totalorder %s151_s4, %s464_s15 }
  0x1b   : > { %p461_p6 = pnand %p459_p5, %p447_p3  ;;  %p467_p10 = scmp.lt.s32.totalorder %s465_s16, %s458_s7 }
  0x1d   : > { %p462_p7 = pneg %p461_p6  ;;  %p468_p13 = por %p467_p10, %p466_p4 }
  0x1f   : > { %p469_p12 = pnand %p468_p13, %p462_p7 }
  0x21   : > { %472 = shalt.err (!%p469_p12)
}
  0x22   : > { %383 = dma.hbm_to_vmem [thread:$0]  (!%p680_p0), %s148_s30, 128, %s151_s4, %s138_s6  }
  0x23   : > { %p698_p5 = pnand %p364_p1, %p176_p2  ;;  %s287_s28 = scalar_lea.hbm %s768_s1, %s372_s27 }
  0x24   : > { %s161_s29 = scalar_lea.vmem [#allocation5], %s358_s26  ;;  %s288_s7 = scalar_lea.hbm %s287_s28, 128 }
  0x25   : > { %s171_s3 = sshll.u32 %s161_s29, 4  ;;  %s158_s8 = scalar_lea.sflag [#allocation6], %s671_s25  ;;  %s172_s3 = int_to_ptr.vmem [resolvable:$true] %s171_s3 }
  0x26   : > { %s486_s15 = scalar_lea.vmem %s172_s3, 128  ;;  %s589_s30 = smov [#allocation5]  }
  0x27   : > { %p487_p12 = scmp.ne.s32.totalorder %s172_s3, %s486_s15  ;;  %s491_s4 = sshll.u32 %s589_s30, 4  ;;  %s492_s4 = int_to_ptr.vmem [resolvable:$false] %s491_s4 }
  0x28   : > { %s493_s6 = scalar_lea.vmem %s492_s4, 256  ;;  %p494_p1 = scmp.lt.s32.totalorder %s172_s3, %s492_s4 }
  0x29   : > { %p489_p6 = pnand %p487_p12, %p447_p3  ;;  %p495_p2 = scmp.lt.s32.totalorder %s493_s6, %s486_s15 }
  0x2b   : > { %p490_p7 = pneg %p489_p6  ;;  %p496_p4 = por %p495_p2, %p494_p1 }
  0x2d   : > { %p497_p10 = pnand %p496_p4, %p490_p7 }
  0x2f   : > { %500 = shalt.err (!%p497_p10)
}
  0x30   : > { %386 = dma.hbm_to_vmem [thread:$0]  (!%p680_p0), %s288_s7, 128, %s172_s3, %s158_s8  }
  0x31   : > { %180 = sbr.rel (%p698_p5) target bundleno = 109 (0x6d), region = 28  ;;  %s714_s25 = sand.u32 (!%p698_p5), 1, %s570_s10  }
  0x32   : > { %s365_s26 = sshll.u32 (!%p698_p5), %s714_s25, 3  ;;  %s183_s27 = scalar_lea.sflag (!%p698_p5), [#allocation3], %s714_s25 }
  0x33   : > { %s186_s16 = scalar_lea.vmem (!%p698_p5), [#allocation2], %s365_s26 }
  0x36   : > { %553 = dma.done.wait (%p653_p8), %s183_s27, 128  }
  0x37   : > { %555 = vsyncadd (%p653_p8), %s183_s27, 4294967168  ;;  %s192_s5 = scalar_lea.sflag [#allocation6], %s714_s25  ;;  %s195_s19 = scalar_lea.vmem [#allocation5], %s365_s26 }
  0x38   : > { %557 = dma.done.wait (%p653_p8), %s192_s5, 128  }
  0x39   : > { %559 = vsyncadd (%p653_p8), %s192_s5, 4294967168  ;;  %v222_v0 = vld [vmem:[%s186_s16] sm:$0xff]  ;;  %v223_v6 = vld [vmem:[%s195_s19] sm:$0xff]  ;;  %s220_s18 = scalar_lea.vmem [#allocation7], %s365_s26  ;;  %s369_s28 = sshll.u32 %s578_s12, 7 }
  0x3a   : > { %v224_v1 = vsub.f32 0.0, %v222_v0  ;;  %s247_s20 = sshll.u32 %s220_s18, 4  ;;  %s245_s3 = scalar_lea.hbm %s769_s2, %s369_s28  ;;  %s248_s20 = int_to_ptr.vmem [resolvable:$true] %s247_s20 }
  0x3b   : > { %s233_s7 = scalar_lea.sflag [#allocation4], %s714_s25  ;;  %s502_s8 = scalar_lea.vmem %s248_s20, 128 }
  0x3c   : > { %v225_v2 = vmul.f32 1.442695, %v224_v1  ;;  %p503_p8 = scmp.ne.s32.totalorder %s248_s20, %s502_s8  ;;  %s590_s15 = smov [#allocation7]  }
  0x3d   : > { %s506_s30 = sshll.u32 %s590_s15, 4  ;;  %s507_s30 = int_to_ptr.vmem [resolvable:$false] %s506_s30 }
  0x3e   : > { %441 = vpow2.f32 %v225_v2  ;;  %p504_p0 = pnand %p503_p8, %p657_p9  ;;  %s508_s4 = scalar_lea.vmem %s507_s30, 256 }
  0x3f   : > { %p509_p13 = scmp.lt.s32.totalorder %s248_s20, %s507_s30  ;;  %p510_p5 = scmp.lt.s32.totalorder %s508_s4, %s502_s8 }
  0x40   : > { %p505_p3 = pneg %p504_p0 }
  0x41   : > { %p511_p12 = por %p510_p5, %p509_p13 }
  0x43   : > { %p512_p6 = pnand %p511_p12, %p505_p3 }
  0x4b   : > { %v442_v3 = vpop.eup %441 }
  0x4c   : > { %v227_v4 = vadd.f32 1.0, %v442_v3 }
  0x4e   : > { %443 = vrcp.f32 %v227_v4 }
  0x5b   : > { %v444_v5 = vpop.eup %443 }
  0x5c   : > { %v229_v7 = vmul.f32 %v444_v5, %v222_v0 }
  0x5e   : > { %v230_v8 = vmul.f32 %v229_v7, %v223_v6 }
  0x60   : > { %231 = vst [vmem:[%s220_s18] sm:$0xff] %v230_v8 }
  0x61   : > { %515 = shalt.err (!%p512_p6)
}
  0x62   : > { %s516_s12 = scalar_lea.hbm %s245_s3, 128  ;;  %s520_s26 = scalar_lea.hbm %s769_s2, 256 }
  0x63   : > { %p517_p7 = scmp.ne.s32.totalorder %s245_s3, %s516_s12  ;;  %p521_p4 = scmp.lt.s32.totalorder %s245_s3, %s769_s2 }
  0x64   : > { %p522_p10 = scmp.lt.s32.totalorder %s520_s26, %s516_s12 }
  0x65   : > { %p518_p1 = pnand %p517_p7, %p657_p9 }
  0x66   : > { %p523_p8 = por %p522_p10, %p521_p4 }
  0x67   : > { %p519_p2 = pneg %p518_p1 }
  0x69   : > { %p524_p0 = pnand %p523_p8, %p519_p2 }
  0x6b   : > { %527 = shalt.err (!%p524_p0)
}
  0x6c   : > { %378 = dma.vmem_to_hbm [thread:$0]  (%p657_p9), %s248_s20, 128, %s245_s3, %s233_s7  }
  0x6d PF: > { %s259_s5 = sand.u32 1, %s566_s9   ;;  %p776_p3 = scmp.ge.s32.totalorder %s586_s14, 2 }
  0x6e   : > { %s260_s19 = scalar_lea.sflag [#allocation4], %s259_s5 }
  0x6f   : > { %p388_p13 = pnand %p776_p3, %p664_p11 }
  0x71   : > { %p389_p5 = pneg %p388_p13 }
  0x73   : > { %561 = dma.done.wait (%p389_p5), %s260_s19, 128  }
  0x74   : > { %563 = vsyncadd (%p389_p5), %s260_s19, 4294967168  ;;  %s21_s14 = sadd.s32 1, %s586_s14   ;;  %s777_s9 = smov %s570_s10 }
  0x75   : > { %p18_p12 = scmp.ge.s32.totalorder %s21_s14, 4   ;;  %s778_s10 = smov %s574_s11 }
  0x76   : > { %s779_s11 = smov %s662_s23  ;;  %s780_s12 = smov %s582_s13 }
  0x77   : > { %s781_s13 = smov %s783_s17  ;;  %20 = sbr.rel (!%p18_p12) target bundleno = 8 (0x8), region = 86 }
  0x7c   :  { %265 = vsyncpa [#allocation3], 1 }
  0x7d   :  { %267 = vsyncpa [#allocation3 + $0x1], 1 }
  0x7e   :  { %268 = vsyncpa [#allocation6], 1 }
  0x7f   :  { %270 = vsyncpa [#allocation6 + $0x1], 1 }
  0x80   :  { %271 = vsyncpa [#allocation4], 1 }
  0x81   :  { %273 = vsyncpa [#allocation4 + $0x1], 1 }

</bundles_post_ra>
